<compile_context>
chip_gen: v5e
topology: v5e:2x2
jax: 0.10.0
libtpu: 0.0.40
codegen_flags: <defaults>
</compile_context>

<pallas_src>
import functools

import jax
import jax.numpy as jnp
from jax.experimental import pallas as pl
from jax.experimental.pallas import tpu as pltpu

BN_EPS = 1e-5
LEAKY_SLOPE = 0.01  # torch.nn.LeakyReLU default negative_slope


# ----------------------------------------------------------------------------
# Pass 1: conv (MXU) + per-block channel sum / sum-of-squares partials
# ----------------------------------------------------------------------------
def _conv_stats_kernel_shift(x_ref, w_ref, y_ref, stats_ref):
    """stride == 1 path.

    x_ref:     (1, C_in, L_pad)   bf16 padded input row (one batch element)
    w_ref:     (K, C_out, C_in)   bf16 weights, K-major so w_ref[kk] is lane-dense
    y_ref:     (1, C_out, L_out)  bf16 conv output (pre-BN), L_out on lanes
    stats_ref: (1, C_out, 2)      f32  [channel_sum, channel_sum_sq] partials
    """
    k = w_ref.shape[0]
    l_out = y_ref.shape[-1]
    # K shifted matmuls, contraction = C_in (avoids materializing im2col in HBM).
    acc = jnp.dot(w_ref[0], x_ref[0, :, 0:l_out], preferred_element_type=jnp.float32)
    for kk in range(1, k):  # static unroll (K is tiny)
        acc = acc + jnp.dot(w_ref[kk], x_ref[0, :, kk:kk + l_out],
                            preferred_element_type=jnp.float32)
    y_ref[0] = acc.astype(y_ref.dtype)
    s = jnp.sum(acc, axis=-1, keepdims=True)          # XLU lane reduce -> (C_out, 1)
    q = jnp.sum(acc * acc, axis=-1, keepdims=True)
    stats_ref[0] = jnp.concatenate([s, q], axis=-1)


def _conv_stats_kernel_gathered(x_ref, w_ref, y_ref, stats_ref):
    """stride > 1 path: input pre-gathered to (C_in*K, L_out) per batch element.

    x_ref: (1, C_in*K, L_out) bf16 ; w_ref: (C_out, C_in*K) bf16
    y_ref: (1, C_out, L_out)  bf16 ; stats_ref: (1, C_out, 2) f32
    """
    acc = jnp.dot(w_ref[...], x_ref[0], preferred_element_type=jnp.float32)
    y_ref[0] = acc.astype(y_ref.dtype)
    s = jnp.sum(acc, axis=-1, keepdims=True)
    q = jnp.sum(acc * acc, axis=-1, keepdims=True)
    stats_ref[0] = jnp.concatenate([s, q], axis=-1)


# ----------------------------------------------------------------------------
# Pass 2: fused BatchNorm affine (single FMA) + LeakyReLU
# ----------------------------------------------------------------------------
def _bn_leakyrelu_kernel(p_ref, y_ref, o_ref):
    """p_ref: (C_out, 2) f32 fused per-channel [scale, shift]
    y_ref / o_ref: (1, C_out, TL) — conv output tile / final output tile."""
    y = y_ref[0].astype(jnp.float32)
    z = y * p_ref[:, 0:1] + p_ref[:, 1:2]          # single pass over the big tensor
    o_ref[0] = jnp.where(z >= 0, z, LEAKY_SLOPE * z).astype(o_ref.dtype)
    # Dropout(0.1): identity (eval semantics) — see TODO at top of file.


def _pick_l_tile(l_out, max_tile=2048):
    """Largest multiple of 128 that divides l_out and is <= max_tile, else full l_out."""
    if l_out % 128 != 0:
        return l_out
    tl = min(l_out, max_tile)
    tl -= tl % 128
    while l_out % tl:
        tl -= 128
    return tl


@functools.partial(jax.jit, static_argnames=("kernel_size", "stride"))
def conv_layer_forward(x, weight, bias, gamma, beta, *, kernel_size, stride):
    """Fused ConvLayer forward.

    x: (N, C_in, L) f32 (NCL); weight: (C_out, C_in, K); bias/gamma/beta: (C_out,)
    Returns (N, C_out, L_out) f32 (NCL — emitted directly, no post-transpose).

    `bias` is accepted for API fidelity but unused: with training-mode BatchNorm the
    per-channel conv bias is cancelled exactly by the batch-mean subtraction. (It must
    be re-added if BN is ever switched to eval / running-stats mode.)
    """
    del bias
    n, c_in, length = x.shape
    c_out = weight.shape[0]
    k = kernel_size
    pad = (-stride + k) // 2
    l_out = (length + 2 * pad - k) // stride + 1

    xp = jnp.pad(x, ((0, 0), (0, 0), (pad, pad))).astype(jnp.bfloat16)

    if stride == 1:
        # No gather at all: kernel slices the padded row in VMEM.
        x_in = xp                                                       # (N, C_in, L_pad)
        w_in = jnp.transpose(weight, (2, 0, 1)).astype(jnp.bfloat16)    # (K, C_out, C_in)
        kern = _conv_stats_kernel_shift
        x_spec = pl.BlockSpec((1, c_in, xp.shape[-1]), lambda b: (b, 0, 0))
        w_spec = pl.BlockSpec((k, c_out, c_in), lambda b: (0, 0, 0))
    else:
        # Strided windows gathered once in the wrapper (blow-up ~K/stride), then a
        # single matmul over C_in*K per batch element inside the kernel.
        idx = (jnp.arange(l_out) * stride)[None, :] + jnp.arange(k)[:, None]  # (K, L_out)
        x_in = xp[:, :, idx].reshape(n, c_in * k, l_out)                # (N, C_in*K, L_out)
        w_in = weight.reshape(c_out, c_in * k).astype(jnp.bfloat16)     # matching (ci,k) order
        kern = _conv_stats_kernel_gathered
        x_spec = pl.BlockSpec((1, c_in * k, l_out), lambda b: (b, 0, 0))
        w_spec = pl.BlockSpec((c_out, c_in * k), lambda b: (0, 0))

    # Per-step VMEM (double-buffered): ~2*(C_in*L_pad*2B + C_out*L_out*2B) + weights.
    # Comfortably below the 48 MiB scoped budget (<= v7x's 64 MiB physical per core).
    vmem_limit = 48 * 1024 * 1024

    cost1 = pl.CostEstimate(
        flops=int(2 * n * c_out * l_out * c_in * k),
        transcendentals=0,
        bytes_accessed=int(x_in.size * x_in.dtype.itemsize
                           + w_in.size * w_in.dtype.itemsize
                           + n * c_out * l_out * 2 + n * c_out * 2 * 4))

    y_conv, stats = pl.pallas_call(
        kern,
        out_shape=(jax.ShapeDtypeStruct((n, c_out, l_out), jnp.bfloat16),
                   jax.ShapeDtypeStruct((n, c_out, 2), jnp.float32)),
        grid=(n,),
        in_specs=[x_spec, w_spec],
        out_specs=[pl.BlockSpec((1, c_out, l_out), lambda b: (b, 0, 0)),
                   pl.BlockSpec((1, c_out, 2), lambda b: (b, 0, 0))],
        compiler_params=pltpu.CompilerParams(
            dimension_semantics=("parallel",),
            vmem_limit_bytes=vmem_limit),
        cost_estimate=cost1,
    )(x_in, w_in)

    # Tiny O(N*C_out) reduction of the per-block partials -> fused (scale, shift).
    count = jnp.float32(n * l_out)
    ch_sum = jnp.sum(stats[:, :, 0], axis=0)
    ch_ssq = jnp.sum(stats[:, :, 1], axis=0)
    mean = ch_sum / count
    var = jnp.maximum(ch_ssq / count - mean * mean, 0.0)   # biased var (torch normalization)
    scale = gamma * jax.lax.rsqrt(var + BN_EPS)
    shift = beta - mean * scale
    params = jnp.stack([scale, shift], axis=-1).astype(jnp.float32)     # (C_out, 2)

    tl = _pick_l_tile(l_out)
    n_lt = l_out // tl
    cost2 = pl.CostEstimate(
        flops=int(3 * n * c_out * l_out),
        transcendentals=0,
        bytes_accessed=int(n * c_out * l_out * (2 + 4) + c_out * 2 * 4))

    out = pl.pallas_call(
        _bn_leakyrelu_kernel,
        out_shape=jax.ShapeDtypeStruct((n, c_out, l_out), jnp.float32),
        grid=(n, n_lt),
        in_specs=[pl.BlockSpec((c_out, 2), lambda b, t: (0, 0)),
                  pl.BlockSpec((1, c_out, tl), lambda b, t: (b, 0, t))],
        out_specs=pl.BlockSpec((1, c_out, tl), lambda b, t: (b, 0, t)),
        compiler_params=pltpu.CompilerParams(
            dimension_semantics=("parallel", "parallel"),
            vmem_limit_bytes=vmem_limit),
        cost_estimate=cost2,
    )(params, y_conv)

    return out


# ----------------------------------------------------------------------------
# Pure-JAX f32 reference (keeps the conv bias, to verify BN cancels it exactly)
# ----------------------------------------------------------------------------
def _reference_forward(x, weight, bias, gamma, beta, *, kernel_size, stride):
    pad = (-stride + kernel_size) // 2
    y = jax.lax.conv_general_dilated(
        x, weight, window_strides=(stride,), padding=[(pad, pad)],
        dimension_numbers=("NCH", "OIH", "NCH")) + bias.reshape(1, -1, 1)
    mean = jnp.mean(y, axis=(0, 2), keepdims=True)
    var = jnp.mean((y - mean) ** 2, axis=(0, 2), keepdims=True)
    y = (y - mean) * jax.lax.rsqrt(var + BN_EPS) * gamma.reshape(1, -1, 1) \
        + beta.reshape(1, -1, 1)
    return jnp.where(y >= 0, y, LEAKY_SLOPE * y)


if __name__ == "__main__":
    key = jax.random.PRNGKey(0)

    def make_case(case_key, n, c_in, c_out, k, length):
        kx, kw, kb, kg, kbe = jax.random.split(case_key, 5)
        x = jax.random.normal(kx, (n, c_in, length), jnp.float32)
        fan_in = c_in * k
        bound = 1.0 / (fan_in ** 0.5)   # torch Conv1d default init range
        weight = jax.random.uniform(kw, (c_out, c_in, k), jnp.float32, -bound, bound)
        bias = jax.random.uniform(kb, (c_out,), jnp.float32, -bound, bound)
        gamma = 1.0 + 0.1 * jax.random.normal(kg, (c_out,), jnp.float32)
        beta = 0.1 * jax.random.normal(kbe, (c_out,), jnp.float32)
        return x, weight, bias, gamma, beta

    # (n, c_in, c_out, k, stride, L): small shapes; case 0 is lane-dense (L_out = 128),
    # case 1 exercises the stride-2 (downsampling) path of ConvLayer.
    cases = [
        (4, 8, 16, 3, 1, 128),
        (4, 8, 16, 3, 2, 128),
    ]
    for i, (n, c_in, c_out, k, stride, length) in enumerate(cases):
        key, sub = jax.random.split(key)
        x, weight, bias, gamma, beta = make_case(sub, n, c_in, c_out, k, length)

        out = conv_layer_forward(x, weight, bias, gamma, beta,
                                 kernel_size=k, stride=stride)
        out = jax.block_until_ready(out)

        ref = _reference_forward(x, weight, bias, gamma, beta,
                                 kernel_size=k, stride=stride)
        pad = (-stride + k) // 2
        l_out = (length + 2 * pad - k) // stride + 1
        assert out.shape == (n, c_out, l_out), (i, out.shape)
        max_err = float(jnp.max(jnp.abs(out - ref)))
        # bf16 matmul inputs / bf16 inter-pass activation -> loose-but-tight tolerance.
        assert jnp.allclose(out, ref, atol=3e-2, rtol=3e-2), (i, max_err)

    print("KERNEL_OK")
</pallas_src>

<mosaic_0001>
module attributes {stable_mosaic.version = 11 : i64} {
  func.func @_bn_leakyrelu_kernel(%arg0: i32, %arg1: i32, %arg2: memref<16x2xf32, #tpu.memory_space<vmem>>, %arg3: memref<1x16x128xbf16, #tpu.memory_space<vmem>>, %arg4: memref<1x16x128xf32, #tpu.memory_space<vmem>>) attributes {dimension_semantics = [#tpu.dimension_semantics<parallel>, #tpu.dimension_semantics<parallel>], iteration_bounds = array<i64: 4, 1>, scalar_prefetch = 0 : i64, scratch_operands = 0 : i64, tpu.core_type = #tpu.core_type<tc>, window_params = [{pipeline_mode = #tpu.pipeline_mode<synchronous>, transform_indices = @transform_0, window_bounds = array<i64: 16, 2>}, {transform_indices = @transform_1, window_bounds = array<i64: 1, 16, 128>}, {transform_indices = @transform_2, window_bounds = array<i64: 1, 16, 128>}]} {
    %c0 = arith.constant 0 : index
    %c0_0 = arith.constant 0 : index
    %c0_1 = arith.constant 0 : index
    %0 = vector.load %arg3[%c0, %c0_0, %c0_1] : memref<1x16x128xbf16, #tpu.memory_space<vmem>>, vector<1x16x128xbf16>
    %1 = vector.shape_cast %0 : vector<1x16x128xbf16> to vector<16x128xbf16>
    %2 = arith.extf %1 : vector<16x128xbf16> to vector<16x128xf32>
    %c0_2 = arith.constant 0 : index
    %c0_3 = arith.constant 0 : index
    %3 = vector.load %arg2[%c0_2, %c0_3] : memref<16x2xf32, #tpu.memory_space<vmem>>, vector<16x1xf32>
    %4 = vector.broadcast %3 : vector<16x1xf32> to vector<16x128xf32>
    %5 = arith.mulf %2, %4 : vector<16x128xf32>
    %c0_4 = arith.constant 0 : index
    %c1 = arith.constant 1 : index
    %6 = vector.load %arg2[%c0_4, %c1] : memref<16x2xf32, #tpu.memory_space<vmem>>, vector<16x1xf32>
    %7 = vector.broadcast %6 : vector<16x1xf32> to vector<16x128xf32>
    %8 = arith.addf %5, %7 : vector<16x128xf32>
    %cst = arith.constant 0.000000e+00 : f32
    %9 = vector.broadcast %cst : f32 to vector<16x128xf32>
    %10 = arith.cmpf oge, %8, %9 : vector<16x128xf32>
    %cst_5 = arith.constant 0.00999999977 : f32
    %11 = vector.broadcast %cst_5 : f32 to vector<16x128xf32>
    %12 = arith.mulf %11, %8 : vector<16x128xf32>
    %13 = arith.select %10, %8, %12 : vector<16x128xi1>, vector<16x128xf32>
    %c0_6 = arith.constant 0 : index
    %c0_7 = arith.constant 0 : index
    %c0_8 = arith.constant 0 : index
    %14 = vector.load %arg4[%c0_6, %c0_7, %c0_8] : memref<1x16x128xf32, #tpu.memory_space<vmem>>, vector<1x16x128xf32>
    %15 = vector.shape_cast %14 : vector<1x16x128xf32> to vector<16x128xf32>
    %16 = vector.shape_cast %13 : vector<16x128xf32> to vector<1x16x128xf32>
    tpu.vector_store %arg4[%c0_6, %c0_7, %c0_8], %16 {strides = array<i32>} : memref<1x16x128xf32, #tpu.memory_space<vmem>>, vector<1x16x128xf32>,
    return
  }
  func.func @transform_0(%arg0: i32, %arg1: i32) -> (i32, i32) {
    %c0_i32 = arith.constant 0 : i32
    %c0_i32_0 = arith.constant 0 : i32
    %c0_i32_1 = arith.constant 0 : i32
    return %c0_i32, %c0_i32_0 : i32, i32
  }
  func.func @transform_1(%arg0: i32, %arg1: i32) -> (i32, i32, i32) {
    %c0_i32 = arith.constant 0 : i32
    %c0_i32_0 = arith.constant 0 : i32
    return %arg0, %c0_i32, %arg1 : i32, i32, i32
  }
  func.func @transform_2(%arg0: i32, %arg1: i32) -> (i32, i32, i32) {
    %c0_i32 = arith.constant 0 : i32
    %c0_i32_0 = arith.constant 0 : i32
    return %arg0, %c0_i32, %arg1 : i32, i32, i32
  }
}

module attributes {stable_mosaic.version = 11 : i64} {
  func.func @_conv_stats_kernel_shift(%arg0: i32, %arg1: memref<1x8x130xbf16, #tpu.memory_space<vmem>>, %arg2: memref<3x16x8xbf16, #tpu.memory_space<vmem>>, %arg3: memref<1x16x128xbf16, #tpu.memory_space<vmem>>, %arg4: memref<1x16x2xf32, #tpu.memory_space<vmem>>) attributes {dimension_semantics = [#tpu.dimension_semantics<parallel>], iteration_bounds = array<i64: 4>, scalar_prefetch = 0 : i64, scratch_operands = 0 : i64, tpu.core_type = #tpu.core_type<tc>, window_params = [{transform_indices = @transform_0, window_bounds = array<i64: 1, 8, 130>}, {pipeline_mode = #tpu.pipeline_mode<synchronous>, transform_indices = @transform_1, window_bounds = array<i64: 3, 16, 8>}, {transform_indices = @transform_2, window_bounds = array<i64: 1, 16, 128>}, {transform_indices = @transform_3, window_bounds = array<i64: 1, 16, 2>}]} {
    %c0 = arith.constant 0 : index
    %c0_0 = arith.constant 0 : index
    %c0_1 = arith.constant 0 : index
    %0 = vector.load %arg2[%c0, %c0_0, %c0_1] : memref<3x16x8xbf16, #tpu.memory_space<vmem>>, vector<1x16x8xbf16>
    %1 = vector.shape_cast %0 : vector<1x16x8xbf16> to vector<16x8xbf16>
    %c0_2 = arith.constant 0 : index
    %c0_3 = arith.constant 0 : index
    %c0_4 = arith.constant 0 : index
    %2 = vector.load %arg1[%c0_2, %c0_3, %c0_4] : memref<1x8x130xbf16, #tpu.memory_space<vmem>>, vector<1x8x128xbf16>
    %3 = vector.shape_cast %2 : vector<1x8x128xbf16> to vector<8x128xbf16>
    %cst = arith.constant dense<0.000000e+00> : vector<16x128xf32>
    %4 = tpu.matmul %1, %3, %cst {dimension_numbers = #tpu.dot_dimension_numbers<[1], [0], [0], [1], [0, 0, 1, 1], [], []>} : vector<16x8xbf16>, vector<8x128xbf16>, vector<16x128xf32> -> vector<16x128xf32>
    %c1 = arith.constant 1 : index
    %c0_5 = arith.constant 0 : index
    %c0_6 = arith.constant 0 : index
    %5 = vector.load %arg2[%c1, %c0_5, %c0_6] : memref<3x16x8xbf16, #tpu.memory_space<vmem>>, vector<1x16x8xbf16>
    %6 = vector.shape_cast %5 : vector<1x16x8xbf16> to vector<16x8xbf16>
    %c0_7 = arith.constant 0 : index
    %c0_8 = arith.constant 0 : index
    %c1_9 = arith.constant 1 : index
    %7 = vector.load %arg1[%c0_7, %c0_8, %c1_9] : memref<1x8x130xbf16, #tpu.memory_space<vmem>>, vector<1x8x128xbf16>
    %8 = vector.shape_cast %7 : vector<1x8x128xbf16> to vector<8x128xbf16>
    %cst_10 = arith.constant dense<0.000000e+00> : vector<16x128xf32>
    %9 = tpu.matmul %6, %8, %cst_10 {dimension_numbers = #tpu.dot_dimension_numbers<[1], [0], [0], [1], [0, 0, 1, 1], [], []>} : vector<16x8xbf16>, vector<8x128xbf16>, vector<16x128xf32> -> vector<16x128xf32>
    %10 = arith.addf %4, %9 : vector<16x128xf32>
    %c2 = arith.constant 2 : index
    %c0_11 = arith.constant 0 : index
    %c0_12 = arith.constant 0 : index
    %11 = vector.load %arg2[%c2, %c0_11, %c0_12] : memref<3x16x8xbf16, #tpu.memory_space<vmem>>, vector<1x16x8xbf16>
    %12 = vector.shape_cast %11 : vector<1x16x8xbf16> to vector<16x8xbf16>
    %c0_13 = arith.constant 0 : index
    %c0_14 = arith.constant 0 : index
    %c2_15 = arith.constant 2 : index
    %13 = vector.load %arg1[%c0_13, %c0_14, %c2_15] : memref<1x8x130xbf16, #tpu.memory_space<vmem>>, vector<1x8x128xbf16>
    %14 = vector.shape_cast %13 : vector<1x8x128xbf16> to vector<8x128xbf16>
    %cst_16 = arith.constant dense<0.000000e+00> : vector<16x128xf32>
    %15 = tpu.matmul %12, %14, %cst_16 {dimension_numbers = #tpu.dot_dimension_numbers<[1], [0], [0], [1], [0, 0, 1, 1], [], []>} : vector<16x8xbf16>, vector<8x128xbf16>, vector<16x128xf32> -> vector<16x128xf32>
    %16 = arith.addf %10, %15 : vector<16x128xf32>
    %17 = arith.truncf %16 : vector<16x128xf32> to vector<16x128xbf16>
    %c0_17 = arith.constant 0 : index
    %c0_18 = arith.constant 0 : index
    %c0_19 = arith.constant 0 : index
    %18 = vector.load %arg3[%c0_17, %c0_18, %c0_19] : memref<1x16x128xbf16, #tpu.memory_space<vmem>>, vector<1x16x128xbf16>
    %19 = vector.shape_cast %18 : vector<1x16x128xbf16> to vector<16x128xbf16>
    %20 = vector.shape_cast %17 : vector<16x128xbf16> to vector<1x16x128xbf16>
    tpu.vector_store %arg3[%c0_17, %c0_18, %c0_19], %20 {strides = array<i32>} : memref<1x16x128xbf16, #tpu.memory_space<vmem>>, vector<1x16x128xbf16>,
    %cst_20 = arith.constant dense<0.000000e+00> : vector<16xf32>
    %21 = vector.multi_reduction <add>, %16, %cst_20 [1] : vector<16x128xf32> to vector<16xf32>
    %22 = vector.shape_cast %21 : vector<16xf32> to vector<16x1xf32>
    %23 = arith.mulf %16, %16 : vector<16x128xf32>
    %cst_21 = arith.constant dense<0.000000e+00> : vector<16xf32>
    %24 = vector.multi_reduction <add>, %23, %cst_21 [1] : vector<16x128xf32> to vector<16xf32>
    %25 = vector.shape_cast %24 : vector<16xf32> to vector<16x1xf32>
    %26 = tpu.concatenate %22, %25 in 1 : vector<16x1xf32>, vector<16x1xf32> -> vector<16x2xf32>
    %c0_22 = arith.constant 0 : index
    %c0_23 = arith.constant 0 : index
    %c0_24 = arith.constant 0 : index
    %27 = vector.load %arg4[%c0_22, %c0_23, %c0_24] : memref<1x16x2xf32, #tpu.memory_space<vmem>>, vector<1x16x2xf32>
    %28 = vector.shape_cast %27 : vector<1x16x2xf32> to vector<16x2xf32>
    %29 = vector.shape_cast %26 : vector<16x2xf32> to vector<1x16x2xf32>
    tpu.vector_store %arg4[%c0_22, %c0_23, %c0_24], %29 {strides = array<i32>} : memref<1x16x2xf32, #tpu.memory_space<vmem>>, vector<1x16x2xf32>,
    return
  }
  func.func @transform_0(%arg0: i32) -> (i32, i32, i32) {
    %c0_i32 = arith.constant 0 : i32
    %c0_i32_0 = arith.constant 0 : i32
    %c0_i32_1 = arith.constant 0 : i32
    return %arg0, %c0_i32, %c0_i32_0 : i32, i32, i32
  }
  func.func @transform_1(%arg0: i32) -> (i32, i32, i32) {
    %c0_i32 = arith.constant 0 : i32
    %c0_i32_0 = arith.constant 0 : i32
    %c0_i32_1 = arith.constant 0 : i32
    %c0_i32_2 = arith.constant 0 : i32
    return %c0_i32, %c0_i32_0, %c0_i32_1 : i32, i32, i32
  }
  func.func @transform_2(%arg0: i32) -> (i32, i32, i32) {
    %c0_i32 = arith.constant 0 : i32
    %c0_i32_0 = arith.constant 0 : i32
    %c0_i32_1 = arith.constant 0 : i32
    return %arg0, %c0_i32, %c0_i32_0 : i32, i32, i32
  }
  func.func @transform_3(%arg0: i32) -> (i32, i32, i32) {
    %c0_i32 = arith.constant 0 : i32
    %c0_i32_0 = arith.constant 0 : i32
    %c0_i32_1 = arith.constant 0 : i32
    return %arg0, %c0_i32, %c0_i32_0 : i32, i32, i32
  }
}

</mosaic_0001>

<bundles_post_ra>
// kernel: conv_layer_forward.2
= control target key start
LH: loop header
LB: loop body
LE: loop exit
PB: predicated region body
PF: predicated region fallthrough
CT: control target
= control target key end

     0   :  { %s482_s12 = smov 0   ;;  %s522_s0 = inlined_call_operand.vmem [shape: bf16[4,8,130], index: 0, kind: input, shape index: {}]   ;;  %s523_s1 = inlined_call_operand.vmem [shape: bf16[3,16,8], index: 1, kind: input, shape index: {}]   ;;  %s524_s2 = inlined_call_operand.vmem [shape: bf16[4,16,128], index: 2, kind: output, shape index: {0}]   ;;  %s525_s3 = inlined_call_operand.vmem [shape: f32[4,16,2], index: 3, kind: output, shape index: {1}]  }
   0x1 LB: > { %s399_s13 = sadd.s32 4294967295, %s458_s12   ;;  %p403_p0 = scmp.ge.s32.totalorder %s458_s12, 1  ;;  %s458_s12 = sphi %s482_s12, %s14_s12  }
   0x2   : > { %p140_p1 = scmp.lt.s32.totalorder %s458_s12, 5 }
   0x4   : > { %p141_p2 = pnand %p403_p0, %p140_p1 }
   0x5   : > { %p169_p3 = scmp.lt.s32.totalorder (!%p141_p2), %s399_s13, 3  ;;  %s460_s18 = smov (!%p141_p2), 127  }
   0x6   : > { %144 = sbr.rel (%p141_p2) target bundleno = 409 (0x199), region = 28  ;;  %s461_s19 = smov (!%p141_p2), 126  }
   0xb   : > { %s527_s13 = smov (!%p169_p3, %s399_s13), 3  ;;  %vm212_vm0 = vcmask 1043456   ;;  %v434_v7 = vld [vmem:[%s523_s1] sm:$0xff]  ;;  %vm208_vm1 = vcmask 64512   ;;  %vm206_vm2 = vcmask 1039360   ;;  %vm267_vm3 = vcmask 1031168  }
   0xc   : > { %s431_s14 = sshll.u32 %s527_s13, 3  ;;  %v435_v16 = vld [vmem:[%s523_s1 + $0x8] sm:$0xff]  ;;  %v436_v17 = vld [vmem:[%s523_s1 + $0x10] sm:$0xff]  ;;  %s433_s29 = sshll.u32 %s527_s13, 4  ;;  %vm305_vm4 = vcmask 7168   ;;  %vm308_vm5 = vcmask 15360  }
   0xd   : > { %s173_s17 = scalar_lea.vmem %s522_s0, %s431_s14  ;;  %s178_s28 = scalar_lea.vmem %s524_s2, %s431_s14 }
   0xe   : > { %v191_v0 = vld [vmem:[%s173_s17] sm:$0xff]  ;;  %s183_s5 = scalar_lea.vmem %s525_s3, %s433_s29 }
   0xf   : > { %v198_v1 = vunpack.c.l.b16 %v191_v0  ;;  %v199_v3 = vunpack.c.h.b16 %v191_v0  ;;  %v187_v5 = vld [vmem:[%s173_s17] sm:$0xf] }
  0x10   : > { %v239_v6 = vsel %vm212_vm0, %v187_v5, 0 }
  0x11   : > { %v200_v2 = vpack.c.b16 %v198_v1, %v198_v1  ;;  %v201_v4 = vpack.c.b16 %v199_v3, %v199_v3  ;;  %248 = vmatpush.bf16.msra.mxu1 %v239_v6 }
  0x13   : > { %202 = vrot.lane.b32.xlu1 %v200_v2, %s460_s18  ;;  %263 = vrot.lane.b32.xlu0 %v200_v2, %s461_s19 }
  0x14   : > { %421 = vmatmul.msk.bf16.vlgmr.msra.gmra.mxu1 %vm208_vm1, %v434_v7 }
  0x1b   : > { %204 = vrot.lane.b32.xlu1 %v201_v4, %s460_s18  ;;  %265 = vrot.lane.b32.xlu0 %v201_v4, %s461_s19 }
  0x85   : > { %v203_v8 = vpop.permute.xlu1 %202  ;;  %v264_v9 = vpop.permute.xlu0 %263 }
  0x8d   : > { %v205_v10 = vpop.permute.xlu1 %204  ;;  %v266_v11 = vpop.permute.xlu0 %265 }
  0x8e   : > { %v207_v12 = vsel %vm206_vm2, %v203_v8, %v205_v10  ;;  %v268_v13 = vsel %vm267_vm3, %v264_v9, %v266_v11 }
  0x8f   : > { %v214_v14 = vsel %vm212_vm0, %v207_v12, 0  ;;  %v273_v15 = vsel %vm212_vm0, %v268_v13, 0 }
  0x90   : > { %223 = vmatpush.bf16.msra.mxu0 %v214_v14  ;;  %282 = vmatpush.bf16.msra.mxu2 %v273_v15 }
  0x91   : > { %v250_v19 = vpop.f32.mrf.mxu1 }
  0x93   : > { %416 = vmatmul.msk.bf16.vlgmr.msra.gmra.mxu0 %vm208_vm1, %v435_v16  ;;  %428 = vmatmul.msk.bf16.vlgmr.msra.gmra.mxu2 %vm208_vm1, %v436_v17 }
  0x99   : > { %v252_v25 = vpop.f32.mrf.mxu1 }
 0x110   : > { %v225_v18 = vpop.f32.mrf.mxu0 }
 0x111   : > { %v251_v20 = vadd.f32 %v250_v19, %v225_v18 }
 0x116   : > { %v284_v21 = vpop.f32.mrf.mxu2 }
 0x117   : > { %v289_v22 = vadd.f32 %v284_v21, %v251_v20 }
 0x118   : > { %v227_v24 = vpop.f32.mrf.mxu0 }
 0x119   : > { %295 = vadd.xlane.f32.xlu2 %v289_v22  ;;  %v299_v23 = vmul.f32 %v289_v22, %v289_v22  ;;  %v253_v26 = vadd.f32 %v252_v25, %v227_v24 }
 0x11b   : > { %301 = vadd.xlane.f32.xlu0 %v299_v23 }
 0x11e   : > { %v286_v27 = vpop.f32.mrf.mxu2 }
 0x11f   : > { %v290_v28 = vadd.f32 %v286_v27, %v253_v26 }
 0x121   : > { %v440_v29 = vpack.c.bf16 %v290_v28, %v289_v22  ;;  %297 = vadd.xlane.f32.xlu2 %v290_v28  ;;  %v300_v30 = vmul.f32 %v290_v28, %v290_v28 }
 0x123   : > { %441 = vst [vmem:[%s178_s28] sm:$0xff] %v440_v29   ;;  %303 = vadd.xlane.f32.xlu1 %v300_v30 }
 0x18c   : > { %v296_v31 = vpop.xlane.xlu2 %295 }
 0x18e   : > { %v302_v32 = vpop.xlane.xlu0 %301 }
 0x18f   : > { %v306_v33 = vsel %vm305_vm4, %v296_v31, %v302_v32 }
 0x190   : > { %309 = vst.msk [vmem:[%s183_s5] sm:$0xff] %vm308_vm5, %v306_v33 }
 0x194   : > { %v298_v34 = vpop.xlane.xlu2 %297 }
 0x196   : > { %v304_v35 = vpop.xlane.xlu1 %303 }
 0x197   : > { %v307_v36 = vsel %vm305_vm4, %v298_v34, %v304_v35 }
 0x198   : > { %310 = vst.msk [vmem:[%s183_s5 + $0x8] sm:$0xff] %vm308_vm5, %v307_v36 }
 0x199 PF: > { %s14_s12 = sadd.s32 1, %s458_s12  }
 0x19a   : > { %p11_p4 = scmp.ge.s32.totalorder %s14_s12, 6  }
 0x19c   :  { %13 = sbr.rel (!%p11_p4) target bundleno = 1 (0x1), region = 72 }

// kernel: conv_layer_forward.3
= control target key start
LH: loop header
LB: loop body
LE: loop exit
PB: predicated region body
PF: predicated region fallthrough
CT: control target
= control target key end

     0   :  { %7 = vsyncpa [#allocation3], 0  ;;  %s581_s0 = inlined_call_operand.vmem [shape: f32[16,2], index: 0, kind: input, shape index: {}]   ;;  %s582_s1 = inlined_call_operand.vmem [shape: bf16[4,16,128], index: 1, kind: input, shape index: {}]   ;;  %s583_s2 = inlined_call_operand.hbm [shape: f32[4,16,128], index: 2, kind: output, shape index: {}]  }
   0x1   :  { %9 = vsyncpa [#allocation3 + $0x1], 0  ;;  %s478_s9 = smov 0   ;;  %s480_s10 = smov 0  }
   0x2   :  { %s482_s11 = smov 0   ;;  %s484_s12 = smov 0  }
   0x3   :  { %s486_s13 = smov 0   ;;  %s488_s14 = smov 0  }
   0x4 LB: > { %s298_s15 = sadd.s32 4294967295, %s457_s14   ;;  %s299_s16 = sadd.s32 4294967294, %s457_s14   ;;  %s457_s14 = sphi %s488_s14, %s15_s14   ;;  %s453_s13 = sphi %s486_s13, %s590_s13   ;;  %s449_s12 = sphi %s484_s12, %s589_s12   ;;  %s445_s11 = sphi %s482_s11, %s588_s11   ;;  %s441_s10 = sphi %s480_s10, %s587_s10   ;;  %s437_s9 = sphi %s478_s9, %s586_s9  }
   0x5   : > { %s27_s17 = sadd.s32 1, %s453_s13  ;;  %s85_s18 = sadd.s32 1, %s445_s11 }
   0x6   : > { %p29_p0 = scmp.ge.s32.totalorder %s27_s17, 4  ;;  %p95_p1 = scmp.ne.s32.totalorder %s445_s11, %s441_s10 }
   0x7   : > { %p96_p2 = scmp.eq.s32.totalorder %s298_s15, 3  ;;  %p101_p3 = scmp.ne.s32.totalorder %s441_s10, %s437_s9 }
   0x8   : > { %s592_s17 = smov (%p29_p0, %s27_s17), 0  ;;  %p102_p5 = scmp.eq.s32.totalorder %s299_s16, 3 }
   0x9   : > { %p518_p4 = por %p96_p2, %p95_p1  ;;  %s80_s20 = ssub.s32 %s453_s13, %s592_s17 }
   0xa   : > { %p302_p6 = scmp.ge.s32.totalorder %s457_s14, 1  ;;  %p83_p7 = scmp.eq.s32.totalorder %s80_s20, 0 }
   0xb   : > { %p525_p8 = por %p102_p5, %p101_p3  ;;  %p134_p9 = scmp.lt.s32.totalorder %s457_s14, 5 }
   0xc   : > { %s531_s22 = scalar_select %p83_p7, %s445_s11, %s85_s18  }
   0xd   : > { %p135_p10 = pnand %p302_p6, %p134_p9 }
   0xe   : > { %p159_p11 = scmp.lt.s32.totalorder (!%p135_p10), %s449_s12, 3  ;;  %s156_s4 = sand.u32 (!%p135_p10), 1, %s441_s10  }
   0xf   : > { %138 = sbr.rel (%p135_p10) target bundleno = 156 (0x9c), region = 28  ;;  %s303_s5 = sshll.u32 (!%p135_p10), %s156_s4, 4 }
  0x10   : > { %s312_s6 = sshll.u32 (!%p135_p10), %s449_s12, 4  ;;  %s158_s16 = scalar_lea.vmem (!%p135_p10), [#allocation2], %s303_s5 }
  0x11   : > { %s216_s15 = scalar_lea.hbm (!%p135_p10), %s583_s2, %s312_s6  ;;  %s217_s18 = sshll.u32 (!%p135_p10), %s158_s16, 4  ;;  %s218_s18 = int_to_ptr.vmem [resolvable:$true] %s217_s18 }
  0x12   : > { %s219_s20 = sshll.u32 (!%p135_p10), %s216_s15, 4  ;;  %s220_s20 = int_to_ptr.hbm [resolvable:$true] %s219_s20 }
  0x13   : > { %s393_s23 = sshra.s32 (!%p135_p10), %s220_s20, 4  ;;  %s394_s23 = int_to_ptr.hbm [resolvable:$true] %s393_s23 }
  0x14   : > { %v171_v0 = vld [vmem:[%s581_s0] sm:$0xff]  ;;  %v459_v1 = vmov 1   ;;  %v460_v2 = vmov 0   ;;  %v172_v3 = vld [vmem:[%s581_s0 + $0x8] sm:$0xff]  ;;  %s160_s27 = scalar_select %p159_p11, %s449_s12, 3 }
  0x15   : > { %377 = vset.pattern.permute.xlu1 %v459_v1  ;;  %376 = vset.pattern.permute.xlu0 %v460_v2  ;;  %s204_s12 = scalar_lea.sflag [#allocation3], %s156_s4  ;;  %s395_s24 = scalar_lea.hbm %s394_s23, 16 }
  0x16   : > { %186 = vperm.xlu1 %377, %v171_v0   ;;  %175 = vperm.xlu0 %376, %v171_v0   ;;  %s311_s28 = sshll.u32 %s160_s27, 3  ;;  %p396_p12 = scmp.ne.s32.totalorder %s394_s23, %s395_s24 }
  0x17   : > { %s166_s3 = scalar_lea.vmem %s582_s1, %s311_s28  ;;  %s399_s27 = scalar_lea.hbm %s583_s2, 64 }
  0x18   : > { %v314_v4 = vld [vmem:[%s166_s3] sm:$0xff]   ;;  %p397_p13 = pnand %p396_p12, %p518_p4  ;;  %p400_p1 = scmp.lt.s32.totalorder %s394_s23, %s583_s2 }
  0x19   : > { %v315_v5 = vunpack.c.l.bf16 %v314_v4  ;;  %v316_v11 = vunpack.c.h.bf16 %v314_v4  ;;  %p401_p2 = scmp.lt.s32.totalorder %s399_s27, %s395_s24 }
  0x1a   : > { %p398_p0 = pneg %p397_p13 }
  0x1b   : > { %p402_p3 = por %p401_p2, %p400_p1 }
  0x1d   : > { %p403_p5 = pnand %p402_p3, %p398_p0 }
  0x1e   : > { %190 = vperm.xlu1 %377, %v172_v3   ;;  %180 = vperm.xlu0 %376, %v172_v3  }
  0x26   : > { %378 = vset.pattern.permute.xlu0 %v459_v1 }
  0x88   : > { %v187_v6 = vpop.permute.xlu1 %186  ;;  %v176_v7 = vpop.permute.xlu0 %175 }
  0x89   : > { %v183_v8 = vmul.f32 %v315_v5, %v176_v7 }
  0x8b   : > { %v193_v9 = vadd.f32 %v187_v6, %v183_v8 }
  0x8d   : > { %vm195_vm0 = vcmp.ge.f32.partialorder %v193_v9, 0.0  ;;  %v197_v10 = vmul.f32 0.01, %v193_v9 }
  0x8f   : > { %v199_v12 = vsel %vm195_vm0, %v193_v9, %v197_v10 }
  0x90   : > { %201 = vst [vmem:[%s158_s16] sm:$0xff] %v199_v12  ;;  %v181_v13 = vpop.permute.xlu0 %180  ;;  %v191_v15 = vpop.permute.xlu1 %190 }
  0x91   : > { %v184_v14 = vmul.f32 %v316_v11, %v181_v13 }
  0x93   : > { %v194_v16 = vadd.f32 %v191_v15, %v184_v14 }
  0x95   : > { %vm196_vm1 = vcmp.ge.f32.partialorder %v194_v16, 0.0  ;;  %v198_v17 = vmul.f32 0.01, %v194_v16 }
  0x97   : > { %v200_v18 = vsel %vm196_vm1, %v194_v16, %v198_v17 }
  0x98   : > { %202 = vst [vmem:[%s158_s16 + $0x8] sm:$0xff] %v200_v18 }
  0x99   : > { %406 = shalt.err (!%p403_p5)
}
  0x9a   : > { %s461_s30 = smov 128   ;;  %s462_s3 = smov 8  }
  0x9b   : > { %317 = dma.vmem_to_hbm [thread:$0]  (%p518_p4), %s218_s18, 256, %s220_s20, %s204_s12, %s461_s30, %s461_s30, %s462_s3  }
  0x9c PF: > { %p323_p6 = scmp.ge.s32.totalorder %s457_s14, 2  ;;  %s234_s4 = sand.u32 1, %s437_s9  }
  0x9d   : > { %s235_s5 = scalar_lea.sflag [#allocation3], %s234_s4 }
  0x9e   : > { %p320_p7 = pnand %p323_p6, %p525_p8 }
  0xa0   : > { %p321_p9 = pneg %p320_p7 }
  0xa2   : > { %432 = dma.done.wait (%p321_p9), %s235_s5, 256  }
  0xa3   : > { %434 = vsyncadd (%p321_p9), %s235_s5, 4294967040  ;;  %s15_s14 = sadd.s32 1, %s457_s14   ;;  %s586_s9 = smov %s441_s10 }
  0xa4   : > { %p12_p10 = scmp.ge.s32.totalorder %s15_s14, 6   ;;  %s587_s10 = smov %s445_s11 }
  0xa5   : > { %s588_s11 = smov %s531_s22  ;;  %s589_s12 = smov %s453_s13 }
  0xa6   : > { %s590_s13 = smov %s592_s17  ;;  %14 = sbr.rel (!%p12_p10) target bundleno = 4 (0x4), region = 63 }
  0xab   :  { %241 = vsyncpa [#allocation3], 1 }
  0xac   :  { %243 = vsyncpa [#allocation3 + $0x1], 1 }

</bundles_post_ra>
